<compile_context>
chip_gen: v7x
topology: tpu7x:2x2x1
jax: 0.10.0
libtpu: 0.0.40
codegen_flags: <defaults>
</compile_context>

<pallas_src>
import functools

import jax
import jax.numpy as jnp
from jax.experimental import pallas as pl
from jax.experimental.pallas import tpu as pltpu


# ----------------------------------------------------------------------------
# Kernels
# ----------------------------------------------------------------------------

def _ffn_kernel_fused(x_ref, w1_ref, b1_ref, w2_ref, b2_ref, o_ref):
    """Single d_ff chunk (grid_f == 1): no accumulator, write output directly."""
    h = jnp.dot(x_ref[...], w1_ref[...], preferred_element_type=jnp.float32)
    h = jnp.maximum(h + b1_ref[...], 0.0)          # bias + ReLU in f32
    # TODO(synk): nn.Dropout is identity in eval mode (reproduced here);
    # training-mode dropout (pltpu.prng_random_bits mask) is not implemented.
    h = h.astype(w2_ref.dtype)                      # match MXU operand dtype
    y = jnp.dot(h, w2_ref[...], preferred_element_type=jnp.float32) + b2_ref[...]
    o_ref[...] = y.astype(o_ref.dtype)


def _ffn_kernel_acc(x_ref, w1_ref, b1_ref, w2_ref, b2_ref, o_ref, acc_ref):
    """Multiple d_ff chunks: f32 VMEM accumulator over the reduction (f) axis."""
    f = pl.program_id(1)

    @pl.when(f == 0)
    def _init():
        acc_ref[...] = jnp.zeros_like(acc_ref)

    h = jnp.dot(x_ref[...], w1_ref[...], preferred_element_type=jnp.float32)
    h = jnp.maximum(h + b1_ref[...], 0.0)           # bias + ReLU in f32
    # TODO(synk): training-mode dropout not implemented (identity / eval mode).
    h = h.astype(w2_ref.dtype)
    acc_ref[...] += jnp.dot(h, w2_ref[...], preferred_element_type=jnp.float32)

    @pl.when(f == pl.num_programs(1) - 1)
    def _finalize():
        o_ref[...] = (acc_ref[...] + b2_ref[...]).astype(o_ref.dtype)


# ----------------------------------------------------------------------------
# Tiling helpers
# ----------------------------------------------------------------------------

def _pick_tile(dim, target, align):
    """Largest multiple of `align` that divides `dim` and is <= `target`;
    falls back to the full dim (always a legal block)."""
    if dim <= target:
        return dim
    t = (target // align) * align
    while t >= align:
        if dim % t == 0:
            return t
        t -= align
    return dim


# ----------------------------------------------------------------------------
# Wrapper
# ----------------------------------------------------------------------------

def feed_forward(x, w1, b1, w2, b2, *, compute_dtype=None,
                 tile_m_target=512, tile_f_target=1024,
                 vmem_limit_bytes=None):
    """Fused FeedForward: relu(x @ w1 + b1) @ w2 + b2.

    x:  (..., d_model)
    w1: (d_model, d_ff)   -- transposed from nn.Linear's (d_ff, d_model)
    b1: (d_ff,)
    w2: (d_ff, d_model)   -- transposed from nn.Linear's (d_model, d_ff)
    b2: (d_model,)
    compute_dtype: None (pure f32) or jnp.bfloat16 (bf16 MXU operands with
                   f32 accumulation) -- recommended on v6e / v7x.
    """
    orig_shape = x.shape
    d_model = orig_shape[-1]
    assert w1.ndim == 2 and w1.shape[0] == d_model, \
        "w1 must be (d_model, d_ff): transpose nn.Linear.weight"
    d_ff = w1.shape[1]
    assert b1.shape == (d_ff,)
    assert w2.shape == (d_ff, d_model), \
        "w2 must be (d_ff, d_model): transpose nn.Linear.weight"
    assert b2.shape == (d_model,)

    m_total = 1
    for s in orig_shape[:-1]:
        m_total *= int(s)
    out_dtype = x.dtype
    x2d = x.reshape(m_total, d_model)

    # Pre-cast narrow operands in the wrapper (halves weight DMA vs in-kernel cast).
    if compute_dtype is not None:
        x2d = x2d.astype(compute_dtype)
        w1 = w1.astype(compute_dtype)
        w2 = w2.astype(compute_dtype)
    b1_2d = b1.astype(jnp.float32).reshape(1, d_ff)
    b2_2d = b2.astype(jnp.float32).reshape(1, d_model)

    # Row-tile alignment: 16 for packed bf16 rows, 8 for f32.
    m_align = 16 if x2d.dtype == jnp.bfloat16 else 8
    tm = _pick_tile(m_total, tile_m_target, m_align)
    # v7x has 2 TensorCores: make the "parallel" row axis have >= 2 tiles
    # whenever the halved tile stays aligned.
    if (m_total // tm) < 2 and m_total % (2 * m_align) == 0:
        tm = m_total // 2
    tf = _pick_tile(d_ff, tile_f_target, 128)

    grid_m = pl.cdiv(m_total, tm)
    grid_f = pl.cdiv(d_ff, tf)

    # VMEM budget: double-buffered tiles + (optional) f32 accumulator.
    xb, wb, ob = x2d.dtype.itemsize, w1.dtype.itemsize, jnp.zeros((), out_dtype).dtype.itemsize
    need = 2 * (tm * d_model * xb            # x row tile
                + d_model * tf * wb          # W1 chunk
                + tf * 4                     # b1 chunk
                + tf * d_model * wb          # W2 chunk
                + d_model * 4                # b2
                + tm * d_model * ob)         # out tile
    if grid_f > 1:
        need += tm * d_model * 4             # f32 accumulator scratch
    if vmem_limit_bytes is None:
        # Sized from the actual footprint; capped at 48 MiB so it is safe on
        # v7x's 64 MiB VMEM while exceeding the 32 MiB scoped default elsewhere.
        vmem_limit_bytes = min(max(need + (8 << 20), 32 << 20), 48 << 20)

    cost = pl.CostEstimate(
        flops=4 * m_total * d_model * d_ff,
        transcendentals=0,
        bytes_accessed=(m_total * d_model * xb + d_model * d_ff * wb
                        + d_ff * d_model * wb + d_ff * 4 + d_model * 4
                        + m_total * d_model * ob),
    )

    if grid_f == 1:
        out = pl.pallas_call(
            _ffn_kernel_fused,
            out_shape=jax.ShapeDtypeStruct((m_total, d_model), out_dtype),
            grid_spec=pltpu.PrefetchScalarGridSpec(
                num_scalar_prefetch=0,
                grid=(grid_m,),
                in_specs=[
                    pl.BlockSpec((tm, d_model), lambda m: (m, 0)),     # x rows
                    pl.BlockSpec((d_model, d_ff), lambda m: (0, 0)),   # W1 (full)
                    pl.BlockSpec((1, d_ff), lambda m: (0, 0)),         # b1
                    pl.BlockSpec((d_ff, d_model), lambda m: (0, 0)),   # W2 (full)
                    pl.BlockSpec((1, d_model), lambda m: (0, 0)),      # b2
                ],
                out_specs=pl.BlockSpec((tm, d_model), lambda m: (m, 0)),
            ),
            compiler_params=pltpu.CompilerParams(
                dimension_semantics=("parallel",),
                vmem_limit_bytes=vmem_limit_bytes,
            ),
            cost_estimate=cost,
        )(x2d, w1, b1_2d, w2, b2_2d)
    else:
        out = pl.pallas_call(
            _ffn_kernel_acc,
            out_shape=jax.ShapeDtypeStruct((m_total, d_model), out_dtype),
            grid_spec=pltpu.PrefetchScalarGridSpec(
                num_scalar_prefetch=0,
                grid=(grid_m, grid_f),
                in_specs=[
                    pl.BlockSpec((tm, d_model), lambda m, f: (m, 0)),   # x rows
                    pl.BlockSpec((d_model, tf), lambda m, f: (0, f)),   # W1 chunk
                    pl.BlockSpec((1, tf), lambda m, f: (0, f)),         # b1 chunk
                    pl.BlockSpec((tf, d_model), lambda m, f: (f, 0)),   # W2 chunk
                    pl.BlockSpec((1, d_model), lambda m, f: (0, 0)),    # b2
                ],
                out_specs=pl.BlockSpec((tm, d_model), lambda m, f: (m, 0)),
                scratch_shapes=[pltpu.VMEM((tm, d_model), jnp.float32)],
            ),
            compiler_params=pltpu.CompilerParams(
                dimension_semantics=("parallel", "arbitrary"),
                vmem_limit_bytes=vmem_limit_bytes,
            ),
            cost_estimate=cost,
        )(x2d, w1, b1_2d, w2, b2_2d)

    return out.reshape(orig_shape)


# ----------------------------------------------------------------------------
# Main
# ----------------------------------------------------------------------------

if __name__ == "__main__":
    # Small shapes consistent with the module; lane-dense (multiples of 128).
    D_MODEL, D_FF = 128, 512
    B, T = 2, 8

    key = jax.random.PRNGKey(0)
    kx, k1, k2, k3, k4 = jax.random.split(key, 5)
    x = jax.random.normal(kx, (B, T, D_MODEL), jnp.float32)
    w1 = jax.random.normal(k1, (D_MODEL, D_FF), jnp.float32) * 0.05
    b1 = jax.random.normal(k2, (D_FF,), jnp.float32) * 0.05
    w2 = jax.random.normal(k3, (D_FF, D_MODEL), jnp.float32) * 0.05
    b2 = jax.random.normal(k4, (D_MODEL,), jnp.float32) * 0.05

    # Pure-JAX reference (dropout is identity in eval mode).
    ref = jnp.maximum(x @ w1 + b1, 0.0) @ w2 + b2

    # 1) f32 path, single d_ff chunk (no accumulator) -- exact module semantics.
    fwd = jax.jit(functools.partial(feed_forward, compute_dtype=None))
    out = jax.block_until_ready(fwd(x, w1, b1, w2, b2))
    assert out.shape == (B, T, D_MODEL)
    assert bool(jnp.all(jnp.isfinite(out)))
    assert bool(jnp.allclose(out, ref, rtol=2e-2, atol=2e-2)), \
        float(jnp.max(jnp.abs(out - ref)))

    # 2) f32 path forced onto the multi-chunk accumulator kernel.
    fwd_acc = jax.jit(functools.partial(feed_forward, compute_dtype=None,
                                        tile_f_target=128))
    out_acc = jax.block_until_ready(fwd_acc(x, w1, b1, w2, b2))
    assert bool(jnp.allclose(out_acc, ref, rtol=2e-2, atol=2e-2)), \
        float(jnp.max(jnp.abs(out_acc - ref)))

    # 3) bf16-operand / f32-accumulate path (recommended for v6e/v7x MXU).
    fwd_bf16 = jax.jit(functools.partial(feed_forward,
                                         compute_dtype=jnp.bfloat16))
    out_bf16 = jax.block_until_ready(fwd_bf16(x, w1, b1, w2, b2))
    assert bool(jnp.all(jnp.isfinite(out_bf16)))
    assert bool(jnp.allclose(out_bf16, ref, rtol=1e-1, atol=1e-1))

    print("KERNEL_OK")
</pallas_src>

<mosaic_0001>
module attributes {stable_mosaic.version = 11 : i64} {
  func.func @_ffn_kernel_fused(%arg0: i32, %arg1: memref<8x128xf32, #tpu.memory_space<vmem>>, %arg2: memref<128x512xf32, #tpu.memory_space<vmem>>, %arg3: memref<1x512xf32, #tpu.memory_space<vmem>>, %arg4: memref<512x128xf32, #tpu.memory_space<vmem>>, %arg5: memref<1x128xf32, #tpu.memory_space<vmem>>, %arg6: memref<8x128xf32, #tpu.memory_space<vmem>>) attributes {dimension_semantics = [#tpu.dimension_semantics<parallel>], iteration_bounds = array<i64: 2>, scalar_prefetch = 0 : i64, scratch_operands = 0 : i64, tpu.core_type = #tpu.core_type<tc>, window_params = [{transform_indices = @transform_0, window_bounds = array<i64: 8, 128>}, {pipeline_mode = #tpu.pipeline_mode<synchronous>, transform_indices = @transform_1, window_bounds = array<i64: 128, 512>}, {pipeline_mode = #tpu.pipeline_mode<synchronous>, transform_indices = @transform_2, window_bounds = array<i64: 1, 512>}, {pipeline_mode = #tpu.pipeline_mode<synchronous>, transform_indices = @transform_3, window_bounds = array<i64: 512, 128>}, {pipeline_mode = #tpu.pipeline_mode<synchronous>, transform_indices = @transform_4, window_bounds = array<i64: 1, 128>}, {transform_indices = @transform_5, window_bounds = array<i64: 8, 128>}]} {
    %c0 = arith.constant 0 : index
    %c0_0 = arith.constant 0 : index
    %0 = vector.load %arg1[%c0, %c0_0] : memref<8x128xf32, #tpu.memory_space<vmem>>, vector<8x128xf32>
    %c0_1 = arith.constant 0 : index
    %c0_2 = arith.constant 0 : index
    %1 = vector.load %arg2[%c0_1, %c0_2] : memref<128x512xf32, #tpu.memory_space<vmem>>, vector<128x512xf32>
    %cst = arith.constant dense<0.000000e+00> : vector<8x512xf32>
    %2 = tpu.matmul %0, %1, %cst {dimension_numbers = #tpu.dot_dimension_numbers<[1], [0], [0], [1], [0, 0, 1, 1], [], []>} : vector<8x128xf32>, vector<128x512xf32>, vector<8x512xf32> -> vector<8x512xf32>
    %c0_3 = arith.constant 0 : index
    %c0_4 = arith.constant 0 : index
    %3 = vector.load %arg3[%c0_3, %c0_4] : memref<1x512xf32, #tpu.memory_space<vmem>>, vector<1x512xf32>
    %4 = vector.broadcast %3 : vector<1x512xf32> to vector<8x512xf32>
    %5 = arith.addf %2, %4 : vector<8x512xf32>
    %cst_5 = arith.constant 0.000000e+00 : f32
    %6 = vector.broadcast %cst_5 : f32 to vector<8x512xf32>
    %7 = arith.maximumf %5, %6 : vector<8x512xf32>
    %c0_6 = arith.constant 0 : index
    %c0_7 = arith.constant 0 : index
    %8 = vector.load %arg4[%c0_6, %c0_7] : memref<512x128xf32, #tpu.memory_space<vmem>>, vector<512x128xf32>
    %cst_8 = arith.constant dense<0.000000e+00> : vector<8x128xf32>
    %9 = tpu.matmul %7, %8, %cst_8 {dimension_numbers = #tpu.dot_dimension_numbers<[1], [0], [0], [1], [0, 0, 1, 1], [], []>} : vector<8x512xf32>, vector<512x128xf32>, vector<8x128xf32> -> vector<8x128xf32>
    %c0_9 = arith.constant 0 : index
    %c0_10 = arith.constant 0 : index
    %10 = vector.load %arg5[%c0_9, %c0_10] : memref<1x128xf32, #tpu.memory_space<vmem>>, vector<1x128xf32>
    %11 = vector.broadcast %10 : vector<1x128xf32> to vector<8x128xf32>
    %12 = arith.addf %9, %11 : vector<8x128xf32>
    %c0_11 = arith.constant 0 : index
    %c0_12 = arith.constant 0 : index
    %13 = vector.load %arg6[%c0_11, %c0_12] : memref<8x128xf32, #tpu.memory_space<vmem>>, vector<8x128xf32>
    tpu.vector_store %arg6[%c0_11, %c0_12], %12 {strides = array<i32>} : memref<8x128xf32, #tpu.memory_space<vmem>>, vector<8x128xf32>,
    return
  }
  func.func @transform_0(%arg0: i32) -> (i32, i32) {
    %c0_i32 = arith.constant 0 : i32
    %c0_i32_0 = arith.constant 0 : i32
    return %arg0, %c0_i32 : i32, i32
  }
  func.func @transform_1(%arg0: i32) -> (i32, i32) {
    %c0_i32 = arith.constant 0 : i32
    %c0_i32_0 = arith.constant 0 : i32
    %c0_i32_1 = arith.constant 0 : i32
    return %c0_i32, %c0_i32_0 : i32, i32
  }
  func.func @transform_2(%arg0: i32) -> (i32, i32) {
    %c0_i32 = arith.constant 0 : i32
    %c0_i32_0 = arith.constant 0 : i32
    %c0_i32_1 = arith.constant 0 : i32
    return %c0_i32, %c0_i32_0 : i32, i32
  }
  func.func @transform_3(%arg0: i32) -> (i32, i32) {
    %c0_i32 = arith.constant 0 : i32
    %c0_i32_0 = arith.constant 0 : i32
    %c0_i32_1 = arith.constant 0 : i32
    return %c0_i32, %c0_i32_0 : i32, i32
  }
  func.func @transform_4(%arg0: i32) -> (i32, i32) {
    %c0_i32 = arith.constant 0 : i32
    %c0_i32_0 = arith.constant 0 : i32
    %c0_i32_1 = arith.constant 0 : i32
    return %c0_i32, %c0_i32_0 : i32, i32
  }
  func.func @transform_5(%arg0: i32) -> (i32, i32) {
    %c0_i32 = arith.constant 0 : i32
    %c0_i32_0 = arith.constant 0 : i32
    return %arg0, %c0_i32 : i32, i32
  }
}

</mosaic_0001>

<bundles_post_ra>
// kernel: feed_forward.1
= control target key start
LH: loop header
LB: loop body
LE: loop exit
PB: predicated region body
PF: predicated region fallthrough
CT: control target
= control target key end

     0   :  { %10 = vsyncpa [#allocation3], 0  ;;  %s1543_s0 = inlined_call_operand.hbm [shape: f32[16,128], index: 0, kind: input, shape index: {}]   ;;  %s1544_s1 = inlined_call_operand.hbm [shape: f32[128,512], index: 1, kind: input, shape index: {}]   ;;  %s1545_s2 = inlined_call_operand.vmem [shape: f32[1,512], index: 2, kind: input, shape index: {}]   ;;  %s1546_s3 = inlined_call_operand.hbm [shape: f32[512,128], index: 3, kind: input, shape index: {}]   ;;  %s1547_s4 = inlined_call_operand.vmem [shape: f32[1,128], index: 4, kind: input, shape index: {}]   ;;  %s1548_s5 = inlined_call_operand.hbm [shape: f32[16,128], index: 5, kind: output, shape index: {}]  }
   0x1   :  { %12 = vsyncpa [#allocation3 + $0x1], 0 }
   0x2   :  { %13 = vsyncpa [#allocation6], 0 }
   0x3   :  { %14 = vsyncpa [#allocation4], 0 }
   0x4   :  { %16 = vsyncpa [#allocation4 + $0x1], 0  ;;  %s1301_s18 = smov 0   ;;  %s1303_s19 = smov 0  }
   0x5   :  { %s1305_s20 = smov 0   ;;  %s1307_s21 = smov 0  }
   0x6 LB: > { %s1322_s22 = sadd.s32 4294967295, %s1260_s21   ;;  %s817_s23 = sadd.s32 4294967294, %s1260_s21   ;;  %s1260_s21 = sphi %s1307_s21, %s1568_s21   ;;  %s1256_s20 = sphi %s1305_s20, %s1567_s20   ;;  %s1252_s19 = sphi %s1303_s19, %s1566_s19   ;;  %s1248_s18 = sphi %s1301_s18, %s1565_s18  }
   0x7   : > { %p42_p0 = scmp.ne.s32.totalorder %s1252_s19, %s1248_s18  ;;  %p1549_p1 = scmp.eq.s32.totalorder %s1322_s22, 0 }
   0x8   : > { %p156_p3 = scmp.eq.s32.totalorder %s817_s23, 1  ;;  %p818_p5 = scmp.ge.s32.totalorder %s1260_s21, 1 }
   0x9   : > { %p1331_p4 = por %p1549_p1, %p42_p0  ;;  %p163_p7 = scmp.lt.s32.totalorder %s1260_s21, 3 }
   0xa   : > { %p1336_p6 = por %p156_p3, %p42_p0  ;;  %s1262_s27 = smov [#allocation5]  }
   0xb   : > { %s1552_s24 = scalar_select %p1331_p4, 1, 0 }
   0xc   : > { %s1553_s25 = scalar_select %p1336_p6, 1, 0 }
   0xd   : > { %p1341_p8 = pnand %p818_p5, %p163_p7  ;;  %s175_s28 = sshll.u32 %s1262_s27, 4  ;;  %s1345_s28 = int_to_ptr.vmem [resolvable:$true] %s175_s28 }
   0xe   : > { %s1263_s30 = smov [#allocation7]   ;;  %s1104_s9 = scalar_lea.hbm %s1544_s1, 8192 }
   0xf   : > { %p1044_p9 = pneg %p1341_p8  ;;  %s191_s6 = sshll.u32 %s1263_s30, 4  ;;  %s1356_s6 = int_to_ptr.vmem [resolvable:$true] %s191_s6 }
  0x10   : > { %p1105_p12 = scmp.ne.s32.totalorder %s1544_s1, %s1104_s9  ;;  %p1111_p5 = scmp.lt.u32.totalorder %s1104_s9, %s1544_s1 }
  0x11   : > { %p1352_p11 = pnand %p1044_p9, %p1549_p1 }
  0x13   : > { %p1106_p13 = pneg %p1352_p11 }
  0x15   : > { %p1107_p0 = pnand %p1106_p13, %p1105_p12 }
  0x17   : > { %p1108_p3 = pneg %p1107_p0 }
  0x19   : > { %p1113_p7 = pnand %p1111_p5, %p1108_p3 }
  0x1b   : > { %1116 = shalt.err (!%p1113_p7)
}
  0x1c   : > { %s1117_s14 = scalar_lea.vmem %s1345_s28, 8192  ;;  %p1125_p2 = scmp.lt.s32.totalorder %s1345_s28, %s1345_s28 }
  0x1d   : > { %p1118_p9 = scmp.ne.s32.totalorder %s1345_s28, %s1117_s14  ;;  %p1126_p12 = scmp.lt.s32.totalorder %s1117_s14, %s1117_s14 }
  0x1f   : > { %p1120_p10 = pnand %p1118_p9, %p1106_p13  ;;  %p1127_p0 = por %p1126_p12, %p1125_p2 }
  0x21   : > { %p1121_p1 = pneg %p1120_p10 }
  0x23   : > { %p1128_p6 = pnand %p1127_p0, %p1121_p1 }
  0x25   : > { %1131 = shalt.err (!%p1128_p6)
}
  0x26   : > { %s1264_s15 = smov 512   ;;  %s1265_s16 = smov 32  }
  0x27   : > { %1047 = dma.hbm_to_vmem [thread:$0]  (!%p1352_p11), %s1544_s1, 8192, %s1345_s28, [#allocation6], %s1264_s15, %s1264_s15, %s1265_s16  }
  0x28   : > { %s1132_s7 = scalar_lea.hbm %s1546_s3, 8192 }
  0x29   : > { %p1133_p2 = scmp.ne.s32.totalorder %s1546_s3, %s1132_s7  ;;  %p1139_p10 = scmp.lt.u32.totalorder %s1132_s7, %s1546_s3 }
  0x2b   : > { %p1135_p1 = pnand %p1133_p2, %p1106_p13 }
  0x2d   : > { %p1136_p6 = pneg %p1135_p1 }
  0x2f   : > { %p1141_p3 = pnand %p1139_p10, %p1136_p6 }
  0x31   : > { %1144 = shalt.err (!%p1141_p3)
}
  0x32   : > { %s1145_s28 = scalar_lea.vmem %s1356_s6, 8192  ;;  %p1153_p12 = scmp.lt.s32.totalorder %s1356_s6, %s1356_s6 }
  0x33   : > { %p1146_p5 = scmp.ne.s32.totalorder %s1356_s6, %s1145_s28  ;;  %p1154_p0 = scmp.lt.s32.totalorder %s1145_s28, %s1145_s28 }
  0x35   : > { %p1148_p7 = pnand %p1146_p5, %p1106_p13  ;;  %p1155_p2 = por %p1154_p0, %p1153_p12 }
  0x37   : > { %p1149_p9 = pneg %p1148_p7 }
  0x39   : > { %p1156_p1 = pnand %p1155_p2, %p1149_p9 }
  0x3b   : > { %1159 = shalt.err (!%p1156_p1)
}
  0x3c   : > { %s1266_s12 = smov 128   ;;  %s1267_s13 = smov 8  }
  0x3d   : > { %1050 = dma.hbm_to_vmem [thread:$0]  (!%p1352_p11), %s1546_s3, 8192, %s1356_s6, [#allocation6], %s1266_s12, %s1266_s12, %s1267_s13  }
  0x3e   : > { %s1411_s16 = sadd.s32 1, %s1260_s21   ;;  %s29_s23 = sadd.s32 1, %s1256_s20 }
  0x3f   : > { %s26_s17 = ssub.s32 %s1260_s21, %s1411_s16  ;;  %p36_p6 = scmp.ne.s32.totalorder %s1256_s20, %s1252_s19 }
  0x40   : > { %p27_p13 = scmp.eq.s32.totalorder %s26_s17, 0  ;;  %p37_p10 = scmp.eq.s32.totalorder %s1260_s21, 0 }
  0x41   : > { %p1556_p5 = scmp.eq.s32.totalorder %s1322_s22, 1  ;;  %p1061_p9 = scmp.lt.s32.totalorder %s1260_s21, 2 }
  0x42   : > { %s1420_s27 = scalar_select %p27_p13, %s1256_s20, %s29_s23  }
  0x43   : > { %p38_p3 = por %p37_p10, %p36_p6  ;;  %p1424_p7 = por %p1556_p5, %p36_p6 }
  0x44   : > { %s208_s29 = sand.u32 1, %s1256_s20   ;;  %s823_s6 = sshll.u32 %s1260_s21, 7 }
  0x45   : > { %s1557_s30 = scalar_select %p1424_p7, 1, 0 }
  0x46   : > { %s822_s7 = sshll.u32 %s208_s29, 3  ;;  %s1434_s10 = scalar_lea.hbm %s1543_s0, %s823_s6 }
  0x47   : > { %s212_s11 = scalar_lea.vmem [#allocation2], %s822_s7  ;;  %p1438_p11 = pnand %p1061_p9, %p38_p3 }
  0x48   : > { %s219_s28 = sshll.u32 %s212_s11, 4  ;;  %s209_s13 = scalar_lea.sflag [#allocation3], %s208_s29  ;;  %s1436_s28 = int_to_ptr.vmem [resolvable:$true] %s219_s28 }
  0x49   : > { %s1160_s14 = scalar_lea.hbm %s1434_s10, 128  ;;  %p1162_p0 = pneg %p1438_p11 }
  0x4a   : > { %p1161_p12 = scmp.ne.s32.totalorder %s1434_s10, %s1160_s14  ;;  %s1165_s23 = scalar_lea.hbm %s1543_s0, 256 }
  0x4b   : > { %p1166_p13 = scmp.lt.u32.totalorder %s1434_s10, %s1543_s0  ;;  %p1167_p6 = scmp.lt.u32.totalorder %s1165_s23, %s1160_s14 }
  0x4c   : > { %p1163_p2 = pnand %p1162_p0, %p1161_p12  ;;  %p1169_p3 = scmp.lt.u32.totalorder %s1160_s14, %s1434_s10 }
  0x4d   : > { %p1168_p10 = por %p1167_p6, %p1166_p13 }
  0x4e   : > { %p1164_p1 = pneg %p1163_p2 }
  0x4f   : > { %p1170_p5 = por %p1169_p3, %p1168_p10 }
  0x51   : > { %p1171_p9 = pnand %p1170_p5, %p1164_p1 }
  0x53   : > { %1174 = shalt.err (!%p1171_p9)
}
  0x54   : > { %s1175_s29 = scalar_lea.vmem %s1436_s28, 128  ;;  %s1268_s8 = smov [#allocation2]  }
  0x55   : > { %p1176_p12 = scmp.ne.s32.totalorder %s1436_s28, %s1175_s29  ;;  %s1180_s9 = sshll.u32 %s1268_s8, 4  ;;  %s1181_s9 = int_to_ptr.vmem [resolvable:$false] %s1180_s9 }
  0x56   : > { %s1182_s11 = scalar_lea.vmem %s1181_s9, 256  ;;  %p1183_p4 = scmp.lt.s32.totalorder %s1436_s28, %s1181_s9 }
  0x57   : > { %p1178_p2 = pnand %p1176_p12, %p1162_p0  ;;  %p1184_p13 = scmp.lt.s32.totalorder %s1182_s11, %s1175_s29 }
  0x59   : > { %p1179_p7 = pneg %p1178_p2  ;;  %p1185_p6 = por %p1184_p13, %p1183_p4 }
  0x5b   : > { %p1186_p10 = pnand %p1185_p6, %p1179_p7 }
  0x5d   : > { %1189 = shalt.err (!%p1186_p10)
}
  0x5e   : > { %1054 = dma.hbm_to_vmem [thread:$0]  (!%p1438_p11), %s1434_s10, 128, %s1436_s28, %s209_s13  }
  0x5f   : > { %228 = sbr.rel (%p1341_p8) target bundleno = 593 (0x251), region = 40  ;;  %s1470_s14 = sand.u32 (!%p1341_p8), 1, %s1252_s19  }
  0x60   : > { %s825_s15 = sshll.u32 (!%p1341_p8), %s1470_s14, 3  ;;  %s231_s17 = scalar_lea.sflag (!%p1341_p8), [#allocation3], %s1470_s14 }
  0x61   : > { %s1476_s23 = scalar_lea.vmem (!%p1341_p8), [#allocation2], %s825_s15  ;;  %p1559_p4 = scmp.ne.s32.totalorder (!%p1341_p8), %s1552_s24, 0 }
  0x66   : > { %1235 = dma.done.wait (%p1559_p4), %s231_s17, 128  }
  0x67   : > { %1237 = vsyncadd (%p1559_p4), %s231_s17, 4294967168  ;;  %p1560_p7 = scmp.eq.s32.totalorder %s1322_s22, 0 }
  0x69   : > { %1239 = dma.done.wait (%p1560_p7), [#allocation6], 16384   ;;  %p1561_p8 = pmov %p1560_p7 }
  0x6a   : > { %v1269_v0 = vmov 0.0   ;;  %v271_v1 = vld [vmem:[#allocation5 + $0x8] sm:$0xff]  ;;  %v273_v3 = vld [vmem:[#allocation5 + $0x18] sm:$0xff]  ;;  %v270_v6 = vld [vmem:[#allocation5] sm:$0xff]  ;;  %s831_s12 = sshll.u32 %s1322_s22, 7  ;;  %s268_s13 = scalar_lea.vmem [#allocation8], %s825_s15 }
  0x6b   : > { %1241 = vsyncadd (%p1561_p8), [#allocation6], 4294950912  ;;  %420 = vmatprep.mubr.f32.mxu0 %v1269_v0  ;;  %491 = vmatprep.mubr.f32.mxu1 %v1269_v0  ;;  %v275_v2 = vld [vmem:[#allocation5 + $0x28] sm:$0xff]  ;;  %v277_v5 = vld [vmem:[#allocation5 + $0x38] sm:$0xff]  ;;  %s728_s7 = sshll.u32 %s268_s13, 4  ;;  %s1499_s8 = scalar_lea.hbm %s1548_s5, %s831_s12  ;;  %s1501_s7 = int_to_ptr.vmem [resolvable:$true] %s728_s7 }
  0x6c   : > { %v904_v4 = vpack.c.bf16 %v275_v2, %v271_v1  ;;  %v274_v7 = vld [vmem:[#allocation5 + $0x20] sm:$0xff]  ;;  %v936_v8 = vpack.c.bf16 %v277_v5, %v273_v3  ;;  %v272_v10 = vld [vmem:[#allocation5 + $0x10] sm:$0xff]  ;;  %v279_v12 = vld [vmem:[#allocation5 + $0x48] sm:$0xff]  ;;  %s715_s9 = scalar_lea.sflag [#allocation4], %s1470_s14  ;;  %s1190_s11 = scalar_lea.vmem %s1501_s7, 128 }
  0x6d   : > { %v906_v9 = vpack.c.bf16 %v274_v7, %v270_v6  ;;  %v276_v11 = vld [vmem:[#allocation5 + $0x30] sm:$0xff]  ;;  %v283_v14 = vld [vmem:[#allocation5 + $0x68] sm:$0xff]  ;;  %v281_v15 = vld [vmem:[#allocation5 + $0x58] sm:$0xff]  ;;  %p1191_p11 = scmp.ne.s32.totalorder %s1501_s7, %s1190_s11  ;;  %p1562_p0 = scmp.ne.s32.totalorder %s1557_s30, 0 }
  0x6e   : > { %905 = vmatprep.subr.bf16.mxu0 %v904_v4  ;;  %v938_v13 = vpack.c.bf16 %v276_v11, %v272_v10  ;;  %v285_v16 = vld [vmem:[#allocation5 + $0x78] sm:$0xff]  ;;  %937 = vmatprep.subr.bf16.mxu1 %v936_v8  ;;  %v908_v17 = vpack.c.bf16 %v283_v14, %v279_v12  ;;  %v278_v19 = vld [vmem:[#allocation5 + $0x40] sm:$0xff]  ;;  %v280_v21 = vld [vmem:[#allocation5 + $0x50] sm:$0xff]  ;;  %s1270_s22 = smov [#allocation8]  }
  0x6f   : > { %907 = vmatpush1.bf16.msra.mxu0 %v906_v9  ;;  %v940_v18 = vpack.c.bf16 %v285_v16, %v281_v15  ;;  %v282_v20 = vld [vmem:[#allocation5 + $0x60] sm:$0xff]  ;;  %v284_v23 = vld [vmem:[#allocation5 + $0x70] sm:$0xff]  ;;  %v287_v24 = vld [vmem:[#allocation5 + $0x88] sm:$0xff]  ;;  %p1192_p1 = pnand %p1191_p11, %p1562_p0  ;;  %s1194_s15 = sshll.u32 %s1270_s22, 4  ;;  %s1195_s15 = int_to_ptr.vmem [resolvable:$false] %s1194_s15 }
  0x70   : > { %939 = vmatpush1.bf16.msra.mxu1 %v938_v13  ;;  %v910_v22 = vpack.c.bf16 %v282_v20, %v278_v19  ;;  %v291_v25 = vld [vmem:[#allocation5 + $0xa8] sm:$0xff]  ;;  %909 = vmatprep.subr.bf16.mxu0 %v908_v17  ;;  %v942_v26 = vpack.c.bf16 %v284_v23, %v280_v21  ;;  %v289_v28 = vld [vmem:[#allocation5 + $0x98] sm:$0xff]  ;;  %v286_v30 = vld [vmem:[#allocation5 + $0x80] sm:$0xff]  ;;  %s1196_s17 = scalar_lea.vmem %s1195_s15, 256  ;;  %p1197_p5 = scmp.lt.s32.totalorder %s1501_s7, %s1195_s15 }
  0x71   : > { %941 = vmatprep.subr.bf16.mxu1 %v940_v18  ;;  %v912_v27 = vpack.c.bf16 %v291_v25, %v287_v24  ;;  %v293_v29 = vld [vmem:[#allocation5 + $0xb8] sm:$0xff]  ;;  %v290_v32 = vld [vmem:[#allocation5 + $0xa0] sm:$0xff]  ;;  %v288_v33 = vld [vmem:[#allocation5 + $0x90] sm:$0xff]  ;;  %p1193_p3 = pneg %p1192_p1  ;;  %p1198_p9 = scmp.lt.s32.totalorder %s1196_s17, %s1190_s11 }
  0x72   : > { %v944_v31 = vpack.c.bf16 %v293_v29, %v289_v28  ;;  %v292_v34 = vld [vmem:[#allocation5 + $0xb0] sm:$0xff]  ;;  %v914_v35 = vpack.c.bf16 %v290_v32, %v286_v30  ;;  %v295_v36 = vld [vmem:[#allocation5 + $0xc8] sm:$0xff]  ;;  %v297_v38 = vld [vmem:[#allocation5 + $0xd8] sm:$0xff] }
  0x73   : > { %911 = vmatpush1.bf16.msra.mxu0 %v910_v22  ;;  %v299_v37 = vld [vmem:[#allocation5 + $0xe8] sm:$0xff]  ;;  %v946_v39 = vpack.c.bf16 %v292_v34, %v288_v33  ;;  %v301_v41 = vld [vmem:[#allocation5 + $0xf8] sm:$0xff]  ;;  %v294_v42 = vld [vmem:[#allocation5 + $0xc0] sm:$0xff]  ;;  %p1199_p12 = por %p1198_p9, %p1197_p5 }
  0x74   : > { %943 = vmatpush1.bf16.msra.mxu1 %v942_v26  ;;  %913 = vmatprep.subr.bf16.mxu0 %v912_v27  ;;  %v916_v40 = vpack.c.bf16 %v299_v37, %v295_v36  ;;  %v298_v43 = vld [vmem:[#allocation5 + $0xe0] sm:$0xff]  ;;  %v948_v44 = vpack.c.bf16 %v301_v41, %v297_v38  ;;  %v296_v45 = vld [vmem:[#allocation5 + $0xd0] sm:$0xff]  ;;  %v303_v47 = vld [vmem:[#allocation5 + $0x108] sm:$0xff] }
  0x75   : > { %945 = vmatprep.subr.bf16.mxu1 %v944_v31  ;;  %v300_v46 = vld [vmem:[#allocation5 + $0xf0] sm:$0xff]  ;;  %v307_v48 = vld [vmem:[#allocation5 + $0x128] sm:$0xff]  ;;  %v305_v49 = vld [vmem:[#allocation5 + $0x118] sm:$0xff]  ;;  %v918_v51 = vpack.c.bf16 %v298_v43, %v294_v42  ;;  %p1200_p2 = pnand %p1199_p12, %p1193_p3 }
  0x76   : > { %v309_v50 = vld [vmem:[#allocation5 + $0x138] sm:$0xff]  ;;  %v950_v52 = vpack.c.bf16 %v300_v46, %v296_v45  ;;  %v920_v53 = vpack.c.bf16 %v307_v48, %v303_v47  ;;  %v302_v54 = vld [vmem:[#allocation5 + $0x100] sm:$0xff]  ;;  %v304_v56 = vld [vmem:[#allocation5 + $0x110] sm:$0xff] }
  0x77   : > { %915 = vmatpush1.bf16.msra.mxu0 %v914_v35  ;;  %v306_v55 = vld [vmem:[#allocation5 + $0x120] sm:$0xff]  ;;  %v952_v57 = vpack.c.bf16 %v309_v50, %v305_v49  ;;  %v308_v58 = vld [vmem:[#allocation5 + $0x130] sm:$0xff]  ;;  %v311_v59 = vld [vmem:[#allocation5 + $0x148] sm:$0xff] }
  0x78   : > { %947 = vmatpush1.bf16.msra.mxu1 %v946_v39  ;;  %917 = vmatprep.subr.bf16.mxu0 %v916_v40  ;;  %v315_v60 = vld [vmem:[#allocation5 + $0x168] sm:$0xff]  ;;  %v313_v61 = vld [vmem:[#allocation5 + $0x158] sm:$0xff]  ;;  %v922_v63 = vpack.c.bf16 %v306_v55, %v302_v54  ;;  %v954_v0 = vpack.c.bf16 %v308_v58, %v304_v56  ;;  %v310_v2 = vld [vmem:[#allocation5 + $0x140] sm:$0xff] }
  0x79   : > { %949 = vmatprep.subr.bf16.mxu1 %v948_v44  ;;  %v317_v62 = vld [vmem:[#allocation5 + $0x178] sm:$0xff]  ;;  %v924_v1 = vpack.c.bf16 %v315_v60, %v311_v59  ;;  %v314_v3 = vld [vmem:[#allocation5 + $0x160] sm:$0xff]  ;;  %v312_v4 = vld [vmem:[#allocation5 + $0x150] sm:$0xff] }
  0x7a   : > { %v956_v5 = vpack.c.bf16 %v317_v62, %v313_v61  ;;  %v316_v6 = vld [vmem:[#allocation5 + $0x170] sm:$0xff]  ;;  %v319_v7 = vld [vmem:[#allocation5 + $0x188] sm:$0xff]  ;;  %v321_v9 = vld [vmem:[#allocation5 + $0x198] sm:$0xff]  ;;  %v926_v11 = vpack.c.bf16 %v314_v3, %v310_v2 }
  0x7b   : > { %919 = vmatpush1.bf16.msra.mxu0 %v918_v51  ;;  %v323_v8 = vld [vmem:[#allocation5 + $0x1a8] sm:$0xff]  ;;  %v325_v10 = vld [vmem:[#allocation5 + $0x1b8] sm:$0xff]  ;;  %v958_v12 = vpack.c.bf16 %v316_v6, %v312_v4  ;;  %v318_v14 = vld [vmem:[#allocation5 + $0x180] sm:$0xff] }
  0x7c   : > { %951 = vmatpush1.bf16.msra.mxu1 %v950_v52  ;;  %921 = vmatprep.subr.bf16.mxu0 %v920_v53  ;;  %v928_v13 = vpack.c.bf16 %v323_v8, %v319_v7  ;;  %v322_v15 = vld [vmem:[#allocation5 + $0x1a0] sm:$0xff]  ;;  %v320_v16 = vld [vmem:[#allocation5 + $0x190] sm:$0xff]  ;;  %v960_v17 = vpack.c.bf16 %v325_v10, %v321_v9  ;;  %v327_v19 = vld [vmem:[#allocation5 + $0x1c8] sm:$0xff] }
  0x7d   : > { %953 = vmatprep.subr.bf16.mxu1 %v952_v57  ;;  %v324_v18 = vld [vmem:[#allocation5 + $0x1b0] sm:$0xff]  ;;  %v331_v20 = vld [vmem:[#allocation5 + $0x1e8] sm:$0xff]  ;;  %v329_v21 = vld [vmem:[#allocation5 + $0x1d8] sm:$0xff]  ;;  %v930_v23 = vpack.c.bf16 %v322_v15, %v318_v14 }
  0x7e   : > { %v333_v22 = vld [vmem:[#allocation5 + $0x1f8] sm:$0xff]  ;;  %v962_v24 = vpack.c.bf16 %v324_v18, %v320_v16  ;;  %v932_v25 = vpack.c.bf16 %v331_v20, %v327_v19  ;;  %v326_v26 = vld [vmem:[#allocation5 + $0x1c0] sm:$0xff]  ;;  %v328_v28 = vld [vmem:[#allocation5 + $0x1d0] sm:$0xff] }
  0x7f   : > { %923 = vmatpush1.bf16.msra.mxu0 %v922_v63  ;;  %v330_v27 = vld [vmem:[#allocation5 + $0x1e0] sm:$0xff]  ;;  %v964_v29 = vpack.c.bf16 %v333_v22, %v329_v21  ;;  %v332_v30 = vld [vmem:[#allocation5 + $0x1f0] sm:$0xff]  ;;  %v519_v32 = vld [vmem:[#allocation7 + $0x88] sm:$0xff] }
  0x80   : > { %955 = vmatpush1.bf16.msra.mxu1 %v954_v0  ;;  %925 = vmatprep.subr.bf16.mxu0 %v924_v1  ;;  %v518_v31 = vld [vmem:[#allocation7 + $0x80] sm:$0xff]  ;;  %v551_v34 = vld [vmem:[#allocation7 + $0x188] sm:$0xff]  ;;  %v934_v35 = vpack.c.bf16 %v330_v27, %v326_v26  ;;  %v966_v36 = vpack.c.bf16 %v332_v30, %v328_v28  ;;  %v520_v43 = vld [vmem:[#allocation7 + $0x90] sm:$0xff] }
  0x81   : > { %957 = vmatprep.subr.bf16.mxu1 %v956_v5  ;;  %v550_v33 = vld [vmem:[#allocation7 + $0x180] sm:$0xff]  ;;  %v968_v37 = vpack.c.bf16 %v519_v32, %v518_v31  ;;  %v503_v39 = vld [vmem:[#allocation7 + $0x8] sm:$0xff]  ;;  %v521_v44 = vld [vmem:[#allocation7 + $0x98] sm:$0xff] }
  0x82   : > { %v502_v38 = vld [vmem:[#allocation7] sm:$0xff]  ;;  %v1000_v41 = vpack.c.bf16 %v551_v34, %v550_v33  ;;  %v535_v42 = vld [vmem:[#allocation7 + $0x108] sm:$0xff]  ;;  %v552_v45 = vld [vmem:[#allocation7 + $0x190] sm:$0xff]  ;;  %v972_v50 = vpack.c.bf16 %v521_v44, %v520_v43 }
  0x83   : > { %927 = vmatpush1.bf16.msra.mxu0 %v926_v11  ;;  %v534_v40 = vld [vmem:[#allocation7 + $0x100] sm:$0xff]  ;;  %v553_v46 = vld [vmem:[#allocation7 + $0x198] sm:$0xff]  ;;  %v970_v48 = vpack.c.bf16 %v503_v39, %v502_v38  ;;  %v504_v51 = vld [vmem:[#allocation7 + $0x10] sm:$0xff] }
  0x84   : > { %959 = vmatpush1.bf16.msra.mxu1 %v958_v12  ;;  %929 = vmatprep.subr.bf16.mxu0 %v928_v13  ;;  %v269_v47 = vld [vmem:[%s1476_s23] sm:$0xff]  ;;  %v1002_v49 = vpack.c.bf16 %v535_v42, %v534_v40  ;;  %v1004_v54 = vpack.c.bf16 %v553_v46, %v552_v45  ;;  %v522_v56 = vld [vmem:[#allocation7 + $0xa0] sm:$0xff]  ;;  %v523_v57 = vld [vmem:[#allocation7 + $0xa8] sm:$0xff] }
  0x85   : > { %961 = vmatprep.subr.bf16.mxu1 %v960_v17  ;;  %v505_v52 = vld [vmem:[#allocation7 + $0x18] sm:$0xff]  ;;  %v536_v53 = vld [vmem:[#allocation7 + $0x110] sm:$0xff]  ;;  %v554_v58 = vld [vmem:[#allocation7 + $0x1a0] sm:$0xff]  ;;  %v976_v62 = vpack.c.bf16 %v523_v57, %v522_v56 }
  0x86   : > { %v537_v55 = vld [vmem:[#allocation7 + $0x118] sm:$0xff]  ;;  %v555_v59 = vld [vmem:[#allocation7 + $0x1a8] sm:$0xff]  ;;  %v974_v60 = vpack.c.bf16 %v505_v52, %v504_v51  ;;  %v506_v63 = vld [vmem:[#allocation7 + $0x20] sm:$0xff] }
  0x87   : > { %931 = vmatpush1.bf16.msra.mxu0 %v930_v23  ;;  %v1006_v61 = vpack.c.bf16 %v537_v55, %v536_v53  ;;  %v507_v0 = vld [vmem:[#allocation7 + $0x28] sm:$0xff]  ;;  %v538_v1 = vld [vmem:[#allocation7 + $0x120] sm:$0xff]  ;;  %v1008_v2 = vpack.c.bf16 %v555_v59, %v554_v58  ;;  %v524_v4 = vld [vmem:[#allocation7 + $0xb0] sm:$0xff] }
  0x88   : > { %963 = vmatpush1.bf16.msra.mxu1 %v962_v24  ;;  %933 = vmatprep.subr.bf16.mxu0 %v932_v25  ;;  %v539_v3 = vld [vmem:[#allocation7 + $0x128] sm:$0xff]  ;;  %v525_v5 = vld [vmem:[#allocation7 + $0xb8] sm:$0xff]  ;;  %v556_v6 = vld [vmem:[#allocation7 + $0x1b0] sm:$0xff]  ;;  %v978_v8 = vpack.c.bf16 %v507_v0, %v506_v63 }
  0x89   : > { %965 = vmatprep.subr.bf16.mxu1 %v964_v29  ;;  %v557_v7 = vld [vmem:[#allocation7 + $0x1b8] sm:$0xff]  ;;  %v1010_v9 = vpack.c.bf16 %v539_v3, %v538_v1  ;;  %v980_v10 = vpack.c.bf16 %v525_v5, %v524_v4  ;;  %v508_v11 = vld [vmem:[#allocation7 + $0x30] sm:$0xff]  ;;  %v526_v16 = vld [vmem:[#allocation7 + $0xc0] sm:$0xff] }
  0x8a   : > { %v509_v12 = vld [vmem:[#allocation7 + $0x38] sm:$0xff]  ;;  %v540_v13 = vld [vmem:[#allocation7 + $0x130] sm:$0xff]  ;;  %v1012_v14 = vpack.c.bf16 %v557_v7, %v556_v6  ;;  %v527_v17 = vld [vmem:[#allocation7 + $0xc8] sm:$0xff] }
  0x8b   : > { %935 = vmatpush1.bf16.msra.mxu0 %v934_v35  ;;  %v541_v15 = vld [vmem:[#allocation7 + $0x138] sm:$0xff]  ;;  %v558_v18 = vld [vmem:[#allocation7 + $0x1c0] sm:$0xff]  ;;  %v559_v19 = vld [vmem:[#allocation7 + $0x1c8] sm:$0xff]  ;;  %v982_v20 = vpack.c.bf16 %v509_v12, %v508_v11  ;;  %v984_v22 = vpack.c.bf16 %v527_v17, %v526_v16 }
  0x8c   : > { %967 = vmatpush1.bf16.msra.mxu1 %v966_v36  ;;  %969 = vmatprep.subr.bf16.mxu0 %v968_v37  ;;  %v1014_v21 = vpack.c.bf16 %v541_v15, %v540_v13  ;;  %v510_v23 = vld [vmem:[#allocation7 + $0x40] sm:$0xff]  ;;  %v511_v24 = vld [vmem:[#allocation7 + $0x48] sm:$0xff]  ;;  %v1016_v26 = vpack.c.bf16 %v559_v19, %v558_v18  ;;  %v528_v28 = vld [vmem:[#allocation7 + $0xd0] sm:$0xff] }
  0x8d   : > { %1001 = vmatprep.subr.bf16.mxu1 %v1000_v41  ;;  %v542_v25 = vld [vmem:[#allocation7 + $0x140] sm:$0xff]  ;;  %v543_v27 = vld [vmem:[#allocation7 + $0x148] sm:$0xff]  ;;  %v529_v29 = vld [vmem:[#allocation7 + $0xd8] sm:$0xff]  ;;  %v986_v32 = vpack.c.bf16 %v511_v24, %v510_v23 }
  0x8e   : > { %421 = vmatmul.mubr.f32.vlgmr.msra.gmra.mrb[0].mxu0 %v269_v47  ;;  %v560_v30 = vld [vmem:[#allocation7 + $0x1d0] sm:$0xff]  ;;  %v561_v31 = vld [vmem:[#allocation7 + $0x1d8] sm:$0xff]  ;;  %v1018_v33 = vpack.c.bf16 %v543_v27, %v542_v25  ;;  %v988_v34 = vpack.c.bf16 %v529_v29, %v528_v28  ;;  %v530_v40 = vld [vmem:[#allocation7 + $0xe0] sm:$0xff] }
  0x8f   : > { %492 = vmatmul.mubr.f32.vlgmr.msra.gmra.mrb[0].mxu1 %v269_v47  ;;  %971 = vmatpush3.bf16.msra.mxu0 %v970_v48  ;;  %v512_v35 = vld [vmem:[#allocation7 + $0x50] sm:$0xff]  ;;  %v513_v36 = vld [vmem:[#allocation7 + $0x58] sm:$0xff]  ;;  %v1020_v38 = vpack.c.bf16 %v561_v31, %v560_v30  ;;  %v531_v41 = vld [vmem:[#allocation7 + $0xe8] sm:$0xff] }
  0x90   : > { %1003 = vmatpush3.bf16.msra.mxu1 %v1002_v49  ;;  %973 = vmatprep.subr.bf16.mxu0 %v972_v50  ;;  %v544_v37 = vld [vmem:[#allocation7 + $0x150] sm:$0xff]  ;;  %v545_v39 = vld [vmem:[#allocation7 + $0x158] sm:$0xff]  ;;  %v562_v42 = vld [vmem:[#allocation7 + $0x1e0] sm:$0xff]  ;;  %v990_v44 = vpack.c.bf16 %v513_v36, %v512_v35  ;;  %v992_v46 = vpack.c.bf16 %v531_v41, %v530_v40 }
  0x91   : > { %1005 = vmatprep.subr.bf16.mxu1 %v1004_v54  ;;  %v563_v43 = vld [vmem:[#allocation7 + $0x1e8] sm:$0xff]  ;;  %v1022_v45 = vpack.c.bf16 %v545_v39, %v544_v37  ;;  %v514_v48 = vld [vmem:[#allocation7 + $0x60] sm:$0xff]  ;;  %v532_v54 = vld [vmem:[#allocation7 + $0xf0] sm:$0xff] }
  0x92   : > { %v1024_v47 = vpack.c.bf16 %v563_v43, %v562_v42  ;;  %v515_v49 = vld [vmem:[#allocation7 + $0x68] sm:$0xff]  ;;  %v546_v50 = vld [vmem:[#allocation7 + $0x160] sm:$0xff]  ;;  %v533_v55 = vld [vmem:[#allocation7 + $0xf8] sm:$0xff] }
  0x93   : > { %975 = vmatpush3.bf16.msra.mxu0 %v974_v60  ;;  %v994_v51 = vpack.c.bf16 %v515_v49, %v514_v48  ;;  %v547_v52 = vld [vmem:[#allocation7 + $0x168] sm:$0xff]  ;;  %v564_v56 = vld [vmem:[#allocation7 + $0x1f0] sm:$0xff]  ;;  %v996_v57 = vpack.c.bf16 %v533_v55, %v532_v54  ;;  %v565_v58 = vld [vmem:[#allocation7 + $0x1f8] sm:$0xff] }
  0x94   : > { %1007 = vmatpush3.bf16.msra.mxu1 %v1006_v61  ;;  %977 = vmatprep.subr.bf16.mxu0 %v976_v62  ;;  %v1026_v53 = vpack.c.bf16 %v547_v52, %v546_v50  ;;  %v516_v59 = vld [vmem:[#allocation7 + $0x70] sm:$0xff]  ;;  %v517_v60 = vld [vmem:[#allocation7 + $0x78] sm:$0xff]  ;;  %v1028_v61 = vpack.c.bf16 %v565_v58, %v564_v56 }
  0x95   : > { %1009 = vmatprep.subr.bf16.mxu1 %v1008_v2  ;;  %v998_v62 = vpack.c.bf16 %v517_v60, %v516_v59  ;;  %v548_v63 = vld [vmem:[#allocation7 + $0x170] sm:$0xff]  ;;  %v549_v0 = vld [vmem:[#allocation7 + $0x178] sm:$0xff]  ;;  %v336_v2 = vlaneseq }
  0x96   : > { %v1030_v1 = vpack.c.bf16 %v549_v0, %v548_v63  ;;  %v334_v5 = vld [vmem:[%s1545_s2] sm:$0xf] }
  0x97   : > { %979 = vmatpush3.bf16.msra.mxu0 %v978_v8  ;;  %v337_v3 = vshrl.u32 %v336_v2, 7  ;;  %v829_v27 = vld [vmem:[%s1547_s4] ss:$0 sm:$0xff] }
  0x98   : > { %1011 = vmatpush3.bf16.msra.mxu1 %v1010_v9  ;;  %981 = vmatprep.subr.bf16.mxu0 %v980_v10 }
  0x99   : > { %1013 = vmatprep.subr.bf16.mxu1 %v1012_v14  ;;  %v338_v4 = vsub.s32 0, %v337_v3  ;;  %v346_v6 = vsub.s32 2, %v337_v3  ;;  %v342_v7 = vsub.s32 1, %v337_v3  ;;  %v350_v8 = vsub.s32 3, %v337_v3 }
  0x9b   : > { %983 = vmatpush3.bf16.msra.mxu0 %v982_v20  ;;  %v339_v9 = vrot.slane %v334_v5, %v338_v4  ;;  %v347_v10 = vrot.slane %v334_v5, %v346_v6  ;;  %v343_v11 = vrot.slane %v334_v5, %v342_v7  ;;  %v351_v12 = vrot.slane %v334_v5, %v350_v8 }
  0x9c   : > { %1015 = vmatpush3.bf16.msra.mxu1 %v1014_v21  ;;  %985 = vmatprep.subr.bf16.mxu0 %v984_v22 }
  0x9d   : > { %1017 = vmatprep.subr.bf16.mxu1 %v1016_v26 }
  0x9f   : > { %987 = vmatpush3.bf16.msra.mxu0 %v986_v32 }
  0xa0   : > { %1019 = vmatpush3.bf16.msra.mxu1 %v1018_v33  ;;  %989 = vmatprep.subr.bf16.mxu0 %v988_v34 }
  0xa1   : > { %1021 = vmatprep.subr.bf16.mxu1 %v1020_v38 }
  0xa3   : > { %991 = vmatpush3.bf16.msra.mxu0 %v990_v44 }
  0xa4   : > { %1023 = vmatpush3.bf16.msra.mxu1 %v1022_v45  ;;  %993 = vmatprep.subr.bf16.mxu0 %v992_v46 }
  0xa5   : > { %1025 = vmatprep.subr.bf16.mxu1 %v1024_v47 }
  0xa7   : > { %995 = vmatpush3.bf16.msra.mxu0 %v994_v51 }
  0xa8   : > { %1027 = vmatpush3.bf16.msra.mxu1 %v1026_v53  ;;  %997 = vmatprep.subr.bf16.mxu0 %v996_v57 }
  0xa9   : > { %1029 = vmatprep.subr.bf16.mxu1 %v1028_v61 }
  0xab   : > { %999 = vmatpush3.bf16.msra.mxu0 %v998_v62 }
  0xac   : > { %1031 = vmatpush3.bf16.msra.mxu1 %v1030_v1 }
 0x161   : > { %v422_v13 = vpop.f32.mrb[0].mxu0 }
 0x162   : > { %v423_v14 = vadd.f32 %v422_v13, %v339_v9  ;;  %v493_v15 = vpop.f32.mrb[0].mxu1  ;;  %v424_v16 = vpop.f32.mrb[1].mxu0 }
 0x163   : > { %v494_v17 = vadd.f32 %v493_v15, %v347_v10  ;;  %v425_v18 = vadd.f32 %v424_v16, %v343_v11  ;;  %v495_v19 = vpop.f32.mrb[1].mxu1 }
 0x164   : > { %v496_v20 = vadd.f32 %v495_v19, %v351_v12  ;;  %v498_v23 = vmax.f32 %v423_v14, 0.0 }
 0x165   : > { %v500_v21 = vmax.f32 %v494_v17, 0.0  ;;  %v499_v22 = vmax.f32 %v425_v18, 0.0 }
 0x166   : > { %v501_v24 = vmax.f32 %v496_v20, 0.0 }
 0x167   : > { %637 = vmatprep.mubr.f32.mxu0 %v499_v22 }
 0x168   : > { %707 = vmatprep.mubr.f32.mxu1 %v501_v24  ;;  %638 = vmatmul.mubr.f32.vlgmr.msra.gmra.mrb[2].mxu0 %v498_v23 }
 0x169   : > { %708 = vmatmul.mubr.f32.vlgmr.msra.gmra.mrb[2].mxu1 %v500_v21 }
 0x23b   : > { %v866_v25 = vpop.f32.mrb[2].mxu0 }
 0x23c   : > { %v901_v26 = vpop.f32.mrb[2].mxu1  ;;  %v867_v28 = vpop.f32.mrb[3].mxu0 }
 0x23d   : > { %v868_v29 = vadd.f32 %v867_v28, %v866_v25  ;;  %v902_v30 = vpop.f32.mrb[3].mxu1 }
 0x23e   : > { %v903_v31 = vadd.f32 %v902_v30, %v901_v26 }
 0x23f   : > { %v640_v32 = vadd.f32 %v868_v29, %v829_v27 }
 0x241   : > { %v710_v33 = vadd.f32 %v903_v31, %v640_v32 }
 0x243   : > { %713 = vst [vmem:[%s268_s13] sm:$0xff] %v710_v33 }
 0x244   : > { %1203 = shalt.err (!%p1200_p2)
}
 0x245   : > { %s1204_s14 = scalar_lea.hbm %s1499_s8, 128  ;;  %s1208_s26 = scalar_lea.hbm %s1548_s5, 256 }
 0x246   : > { %p1205_p13 = scmp.ne.s32.totalorder %s1499_s8, %s1204_s14  ;;  %p1209_p4 = scmp.lt.u32.totalorder %s1499_s8, %s1548_s5 }
 0x247   : > { %p1210_p7 = scmp.lt.u32.totalorder %s1208_s26, %s1204_s14  ;;  %p1212_p11 = scmp.lt.u32.totalorder %s1204_s14, %s1499_s8 }
 0x248   : > { %p1206_p6 = pnand %p1205_p13, %p1562_p0 }
 0x249   : > { %p1211_p8 = por %p1210_p7, %p1209_p4 }
 0x24a   : > { %p1207_p10 = pneg %p1206_p6 }
 0x24b   : > { %p1213_p1 = por %p1212_p11, %p1211_p8 }
 0x24d   : > { %p1214_p3 = pnand %p1213_p1, %p1207_p10 }
 0x24f   : > { %1217 = shalt.err (!%p1214_p3)
}
 0x250   : > { %1042 = dma.vmem_to_hbm [thread:$0]  (%p1562_p0), %s1501_s7, 128, %s1499_s8, %s715_s9  }
 0x251 PF: > { %s740_s12 = sand.u32 1, %s1248_s18   ;;  %p1563_p5 = scmp.ne.s32.totalorder %s1553_s25, 0 }
 0x252   : > { %p1564_p9 = scmp.ge.s32.totalorder %s1260_s21, 2  ;;  %s741_s13 = scalar_lea.sflag [#allocation4], %s740_s12 }
 0x254   : > { %p1056_p12 = pnand %p1564_p9, %p1563_p5 }
 0x256   : > { %1243 = dma.done.wait (!%p1056_p12), %s741_s13, 128  }
 0x257   : > { %1245 = vsyncadd (!%p1056_p12), %s741_s13, 4294967168  ;;  %p19_p2 = scmp.ge.s32.totalorder %s1411_s16, 4   ;;  %s1565_s18 = smov %s1252_s19 }
 0x258   : > { %s1566_s19 = smov %s1256_s20  ;;  %s1567_s20 = smov %s1420_s27 }
 0x259   : > { %s1568_s21 = smov %s1411_s16  ;;  %21 = sbr.rel (!%p19_p2) target bundleno = 6 (0x6), region = 93 }
 0x260   :  { %746 = vsyncpa [#allocation3], 1 }
 0x261   :  { %748 = vsyncpa [#allocation3 + $0x1], 1 }
 0x262   :  { %749 = vsyncpa [#allocation6], 1 }
 0x263   :  { %750 = vsyncpa [#allocation4], 1 }
 0x264   :  { %752 = vsyncpa [#allocation4 + $0x1], 1 }

</bundles_post_ra>
